<compile_context>
chip_gen: v6e
topology: v6e:2x2x1
jax: 0.10.0
libtpu: 0.0.40
codegen_flags: <defaults>
</compile_context>

<pallas_src>
import functools
import math

import jax
import jax.numpy as jnp
from jax.experimental import pallas as pl
from jax.experimental.pallas import tpu as pltpu

EPS = 1e-5


# --------------------------- helpers -----------------------------------------

def _round_up(x, m):
    return ((x + m - 1) // m) * m


def _apply_act(y, act):
    if act == "relu6":
        return jnp.clip(y, 0.0, 6.0)
    if act == "relu":
        return jnp.maximum(y, 0.0)
    return y


def _pick_row_tile(ho):
    for th in (16, 14, 8, 7, 4, 2, 1):
        if th <= ho and ho % th == 0:
            return th
    return ho


# --------------------------- Pallas kernels ----------------------------------

def _mm_kernel(x_ref, w_ref, s_ref, b_ref, o_ref, *, act):
    # o = act((x @ w) * scale + bias)
    y = jnp.dot(x_ref[...], w_ref[...], preferred_element_type=jnp.float32)
    y = y * s_ref[...] + b_ref[...]
    y = _apply_act(y, act)
    o_ref[...] = y.astype(o_ref.dtype)


def _mm_res_kernel(x_ref, w_ref, s_ref, b_ref, r_ref, o_ref, *, act):
    # o = act((x @ w) * scale + bias) + residual
    y = jnp.dot(x_ref[...], w_ref[...], preferred_element_type=jnp.float32)
    y = y * s_ref[...] + b_ref[...]
    y = _apply_act(y, act)
    o_ref[...] = (y + r_ref[...].astype(jnp.float32)).astype(o_ref.dtype)


def _dw_s1_kernel(x_ref, w_ref, s_ref, b_ref, o_ref, *, th, wo):
    # stride-1 3x3 depthwise conv + BN + ReLU6 on a row tile.
    # x_ref: (1, Hp, Wp, C) full padded image for this batch element (resident
    # in VMEM across the row-tile grid axis); taps are gathered in-kernel.
    h = pl.program_id(1)
    row0 = h * th
    acc = None
    for kh in range(3):
        rows = x_ref[0, pl.ds(row0 + kh, th), :, :].astype(jnp.float32)  # (th,Wp,C)
        for kw in range(3):
            tap = rows[:, kw:kw + wo, :]
            term = tap * w_ref[kh * 3 + kw]
            acc = term if acc is None else acc + term
    y = acc * s_ref[0] + b_ref[0]
    o_ref[0] = jnp.clip(y, 0.0, 6.0).astype(o_ref.dtype)


def _dw_s2_kernel(p00_ref, p01_ref, p10_ref, p11_ref, w_ref, s_ref, b_ref,
                  o_ref, *, ho, wo):
    # stride-2 3x3 depthwise conv + BN + ReLU6 from a 2x2 phase decomposition.
    # phase[rh][rw][i, j, :] = x_pad[2i+rh, 2j+rw, :]
    ph = [[p00_ref[0].astype(jnp.float32), p01_ref[0].astype(jnp.float32)],
          [p10_ref[0].astype(jnp.float32), p11_ref[0].astype(jnp.float32)]]
    acc = None
    for kh in range(3):
        for kw in range(3):
            pv = ph[kh % 2][kw % 2]
            dh, dw = kh // 2, kw // 2
            tap = pv[dh:dh + ho, dw:dw + wo, :]
            term = tap * w_ref[kh * 3 + kw]
            acc = term if acc is None else acc + term
    y = acc * s_ref[0] + b_ref[0]
    o_ref[0] = jnp.clip(y, 0.0, 6.0).astype(o_ref.dtype)


def _add_bn_kernel(a_ref, b_ref, s_ref, c_ref, o_ref):
    # o = (a + b) * scale + bias     (the wavelet block's bnx(x + Lin))
    y = a_ref[...].astype(jnp.float32) + b_ref[...].astype(jnp.float32)
    y = y * s_ref[0] + c_ref[0]
    o_ref[...] = y.astype(o_ref.dtype)


def _gap_kernel(x_ref, o_ref):
    # global average pool: (N, H, W, C) -> (N, C), f32 accumulation.
    o_ref[...] = jnp.mean(x_ref[...].astype(jnp.float32), axis=(1, 2))


# --------------------------- kernel wrappers ----------------------------------

def matmul_bn_act(x, w, scale, bias, act="none", residual=None,
                  out_dtype=jnp.bfloat16):
    """o = act((x @ w) * scale + bias) [+ residual].  x:(M,K) w:(K,N).

    bf16 MXU inputs, f32 accumulation/epilogue.  Tiled over M (and N when N is
    large) with Pallas auto-pipelining; K is a single full block (K<=1280)."""
    M, K = x.shape
    K2, N = w.shape
    assert K2 == K

    xb = x.astype(jnp.bfloat16)
    wb = w.astype(jnp.bfloat16)
    s2 = scale.reshape(1, N).astype(jnp.float32)
    b2 = bias.reshape(1, N).astype(jnp.float32)
    rb = None if residual is None else residual.astype(jnp.bfloat16)

    # Pad K to a multiple of 8 (only hits the tiny 3- and 27-wide cases).
    Kp = _round_up(max(K, 8), 8)
    if Kp != K:
        xb = jnp.pad(xb, ((0, 0), (0, Kp - K)))
        wb = jnp.pad(wb, ((0, Kp - K), (0, 0)))

    # Tile selection: lane-dense outputs, everything comfortably inside VMEM
    # (including v7x's 64 MiB), M gives the pipelined/parallel grid axis.
    tm = M if M <= 256 else 256
    tn = N if N <= 640 else 256
    Mp = _round_up(M, tm)
    Np = _round_up(N, tn)
    if Mp != M:
        xb = jnp.pad(xb, ((0, Mp - M), (0, 0)))
    if Np != N:
        wb = jnp.pad(wb, ((0, 0), (0, Np - N)))
        s2 = jnp.pad(s2, ((0, 0), (0, Np - N)))
        b2 = jnp.pad(b2, ((0, 0), (0, Np - N)))
    if rb is not None and (Mp != M or Np != N):
        rb = jnp.pad(rb, ((0, Mp - M), (0, Np - N)))

    grid = (Mp // tm, Np // tn)
    x_spec = pl.BlockSpec((tm, Kp), lambda i, j: (i, 0))
    w_spec = pl.BlockSpec((Kp, tn), lambda i, j: (0, j))
    s_spec = pl.BlockSpec((1, tn), lambda i, j: (0, j))
    b_spec = pl.BlockSpec((1, tn), lambda i, j: (0, j))
    r_spec = pl.BlockSpec((tm, tn), lambda i, j: (i, j))
    o_spec = pl.BlockSpec((tm, tn), lambda i, j: (i, j))
    cp = pltpu.CompilerParams(dimension_semantics=("parallel", "parallel"))
    out_shape = jax.ShapeDtypeStruct((Mp, Np), out_dtype)

    if rb is None:
        out = pl.pallas_call(
            functools.partial(_mm_kernel, act=act),
            out_shape=out_shape, grid=grid,
            in_specs=[x_spec, w_spec, s_spec, b_spec],
            out_specs=o_spec, compiler_params=cp,
        )(xb, wb, s2, b2)
    else:
        out = pl.pallas_call(
            functools.partial(_mm_res_kernel, act=act),
            out_shape=out_shape, grid=grid,
            in_specs=[x_spec, w_spec, s_spec, b_spec, r_spec],
            out_specs=o_spec, compiler_params=cp,
        )(xb, wb, s2, b2, rb)

    if Mp != M or Np != N:
        out = out[:M, :N]
    return out


def pointwise_conv_bn(x, w_kc, scale, bias, act, residual=None):
    """1x1 conv + BN (+act / +residual).  x:(N,H,W,Cin), w_kc:(Cin,Cout)."""
    N, H, W, C = x.shape
    Cout = w_kc.shape[1]
    x2 = x.reshape(N * H * W, C)
    r2 = None if residual is None else residual.reshape(N * H * W, Cout)
    out = matmul_bn_act(x2, w_kc, scale, bias, act=act, residual=r2)
    return out.reshape(N, H, W, Cout)


def conv3x3_bn_act(x, w_kc, scale, bias, stride, act, residual=None):
    """Dense 3x3 conv (pad=1) via im2col + tiled Pallas matmul.

    Only used for 3-input-channel convolutions (stem, wavelet supplement), so
    the JAX-side im2col inflation is tiny.  w_kc:(9*Cin, Cout), (kh,kw,cin)."""
    # TODO(synk): gather the 9 taps in-kernel to avoid the (small) im2col copy.
    N, H, W, C = x.shape
    Cout = w_kc.shape[1]
    xp = jnp.pad(x, ((0, 0), (1, 1), (1, 1), (0, 0)))
    Ho = (H + 2 - 3) // stride + 1
    Wo = (W + 2 - 3) // stride + 1
    taps = [xp[:, kh:kh + stride * (Ho - 1) + 1:stride,
               kw:kw + stride * (Wo - 1) + 1:stride, :]
            for kh in range(3) for kw in range(3)]
    patches = jnp.concatenate(taps, axis=-1).reshape(N * Ho * Wo, 9 * C)
    r2 = None if residual is None else residual.reshape(N * Ho * Wo, Cout)
    out = matmul_bn_act(patches, w_kc, scale, bias, act=act, residual=r2)
    return out.reshape(N, Ho, Wo, Cout)


def depthwise3x3_bn_relu6(x, w9c, scale, bias, stride):
    """Depthwise 3x3 conv (pad=1) + BN + ReLU6.  x:(N,H,W,C), w9c:(9,C) f32."""
    N, H, W, C = x.shape
    xb = x.astype(jnp.bfloat16)
    s2 = scale.reshape(1, C).astype(jnp.float32)
    b2 = bias.reshape(1, C).astype(jnp.float32)
    w9c = w9c.astype(jnp.float32)
    xp = jnp.pad(xb, ((0, 0), (1, 1), (1, 1), (0, 0)))

    if stride == 1:
        Ho, Wo = H, W
        th = _pick_row_tile(Ho)
        grid = (N, Ho // th)
        return pl.pallas_call(
            functools.partial(_dw_s1_kernel, th=th, wo=Wo),
            out_shape=jax.ShapeDtypeStruct((N, Ho, Wo, C), jnp.bfloat16),
            grid=grid,
            in_specs=[
                pl.BlockSpec((1, H + 2, W + 2, C), lambda n, h: (n, 0, 0, 0)),
                pl.BlockSpec((9, C), lambda n, h: (0, 0)),
                pl.BlockSpec((1, C), lambda n, h: (0, 0)),
                pl.BlockSpec((1, C), lambda n, h: (0, 0)),
            ],
            out_specs=pl.BlockSpec((1, th, Wo, C), lambda n, h: (n, h, 0, 0)),
            compiler_params=pltpu.CompilerParams(
                dimension_semantics=("parallel", "parallel")),
        )(xp, w9c, s2, b2)

    # stride 2: 2x2 phase decomposition (one input-sized copy instead of 9x).
    assert H % 2 == 0 and W % 2 == 0
    Ho, Wo = H // 2, W // 2
    phases = [xp[:, rh:rh + 2 * Ho + 1:2, rw:rw + 2 * Wo + 1:2, :]
              for rh in (0, 1) for rw in (0, 1)]        # each (N, Ho+1, Wo+1, C)
    p_spec = pl.BlockSpec((1, Ho + 1, Wo + 1, C), lambda n: (n, 0, 0, 0))
    return pl.pallas_call(
        functools.partial(_dw_s2_kernel, ho=Ho, wo=Wo),
        out_shape=jax.ShapeDtypeStruct((N, Ho, Wo, C), jnp.bfloat16),
        grid=(N,),
        in_specs=[p_spec, p_spec, p_spec, p_spec,
                  pl.BlockSpec((9, C), lambda n: (0, 0)),
                  pl.BlockSpec((1, C), lambda n: (0, 0)),
                  pl.BlockSpec((1, C), lambda n: (0, 0))],
        out_specs=pl.BlockSpec((1, Ho, Wo, C), lambda n: (n, 0, 0, 0)),
        compiler_params=pltpu.CompilerParams(dimension_semantics=("parallel",)),
    )(*phases, w9c, s2, b2)


def add_bn(a, b, scale, bias):
    """o = (a + b) * scale + bias, per-channel scale/bias (wavelet bnx)."""
    N, H, W, C = a.shape
    s2 = scale.reshape(1, C).astype(jnp.float32)
    b2 = bias.reshape(1, C).astype(jnp.float32)
    blk = pl.BlockSpec((1, H, W, C), lambda n: (n, 0, 0, 0))
    return pl.pallas_call(
        _add_bn_kernel,
        out_shape=jax.ShapeDtypeStruct((N, H, W, C), jnp.bfloat16),
        grid=(N,),
        in_specs=[blk, blk,
                  pl.BlockSpec((1, C), lambda n: (0, 0)),
                  pl.BlockSpec((1, C), lambda n: (0, 0))],
        out_specs=pl.BlockSpec((1, H, W, C), lambda n: (n, 0, 0, 0)),
        compiler_params=pltpu.CompilerParams(dimension_semantics=("parallel",)),
    )(a.astype(jnp.bfloat16), b.astype(jnp.bfloat16), s2, b2)


def global_avg_pool(x):
    N, H, W, C = x.shape
    return pl.pallas_call(
        _gap_kernel,
        out_shape=jax.ShapeDtypeStruct((N, C), jnp.float32),
        grid=(1,),
        in_specs=[pl.BlockSpec((N, H, W, C), lambda i: (0, 0, 0, 0))],
        out_specs=pl.BlockSpec((N, C), lambda i: (0, 0)),
    )(x)


# --------------------------- wavelet (Haar LL) --------------------------------

def haar_ll(x):
    """Single-level Haar DWT approximation band, 'periodization' mode.

    For even-length signals this is the 2x2 block sum scaled by 1/2; the
    reference forward only consumes the LL band (Yh is discarded).
    TODO(synk): pywt boundary handling for odd sizes / exact phase convention
                is not reproduced; requires even H and W (true for this net)."""
    N, H, W, C = x.shape
    y = x.astype(jnp.float32).reshape(N, H // 2, 2, W // 2, 2, C)
    ll = (y[:, :, 0, :, 0] + y[:, :, 0, :, 1]
          + y[:, :, 1, :, 0] + y[:, :, 1, :, 1]) * 0.5
    return ll.astype(x.dtype)


# --------------------------- parameter construction ---------------------------

def _make_divisible(v, divisor, min_value=None):
    if min_value is None:
        min_value = divisor
    new_v = max(min_value, int(v + divisor / 2) // divisor * divisor)
    if new_v < 0.9 * v:
        new_v += divisor
    return new_v


class KeyGen:
    def __init__(self, key):
        self.key = key

    def __call__(self):
        self.key, sub = jax.random.split(self.key)
        return sub


def init_conv_weight(kg, cout, cin, k):
    # PyTorch init: normal(0, sqrt(2 / (k*k*out_channels)))
    n = k * k * cout
    return math.sqrt(2.0 / n) * jax.random.normal(kg(), (cout, cin, k, k),
                                                  jnp.float32)


def bn_scale_bias(c):
    gamma = jnp.ones((c,), jnp.float32)
    beta = jnp.zeros((c,), jnp.float32)
    running_mean = jnp.zeros((c,), jnp.float32)
    running_var = jnp.ones((c,), jnp.float32)
    scale = gamma / jnp.sqrt(running_var + EPS)
    bias = beta - running_mean * scale
    return scale, bias


def build_params(key, num_classes=1000, width_mult=1.0):
    kg = KeyGen(key)
    cfgs = [[1, 16, 1, 1], [6, 24, 2, 2], [6, 32, 3, 2], [6, 64, 4, 2],
            [6, 96, 3, 1], [6, 160, 3, 2], [6, 320, 1, 1]]
    div = 4 if width_mult == 0.1 else 8
    params = {}

    input_channel = _make_divisible(32 * width_mult, div)
    w_stem = init_conv_weight(kg, input_channel, 3, 3)
    s_st, b_st = bn_scale_bias(input_channel)
    params['stem'] = dict(
        w=jnp.transpose(w_stem, (2, 3, 1, 0)).reshape(9 * 3, input_channel)
          .astype(jnp.bfloat16),
        s=s_st, b=b_st)

    def make_wavelet_block(cin, cout):
        # Block_lite_lite: 1x1 conv (bias) + BN + ReLU, 3x3 conv (bias) + BN +
        # ReLU supplement, bnx.  Conv biases (zero-init) folded into BN bias.
        w_in = init_conv_weight(kg, cout, cin, 1).reshape(cout, cin)
        bias_in = jnp.zeros((cout,), jnp.float32)
        s_in, b_in = bn_scale_bias(cout)
        w_sup = init_conv_weight(kg, cout, 3, 3)
        bias_sup = jnp.zeros((cout,), jnp.float32)
        s_sup, b_sup = bn_scale_bias(cout)
        s_x, b_x = bn_scale_bias(cout)
        return dict(
            w_in=w_in.T.astype(jnp.bfloat16),
            s_in=s_in, b_in=b_in + bias_in * s_in,
            w_sup=jnp.transpose(w_sup, (2, 3, 1, 0)).reshape(27, cout)
                  .astype(jnp.bfloat16),
            s_sup=s_sup, b_sup=b_sup + bias_sup * s_sup,
            s_x=s_x, b_x=b_x)

    wavelet_blocks = [make_wavelet_block(3, input_channel)]   # wavelet_conv
    lastchannel = input_channel

    stages = []
    inp_c = input_channel
    for si, (t, c, n, s_) in enumerate(cfgs):
        out_c = _make_divisible(c * width_mult, div)
        blocks = []
        for i in range(n):
            stride = s_ if i == 0 else 1
            hidden = int(round(inp_c * t))
            blk = dict(stride=stride, expand_ratio=t,
                       identity=(stride == 1 and inp_c == out_c))
            if t != 1:
                w_e = init_conv_weight(kg, hidden, inp_c, 1).reshape(hidden, inp_c)
                blk['w_exp'] = w_e.T.astype(jnp.bfloat16)
                blk['s_exp'], blk['b_exp'] = bn_scale_bias(hidden)
            w_dw = init_conv_weight(kg, hidden, 1, 3)           # (hidden,1,3,3)
            blk['w_dw'] = jnp.transpose(w_dw[:, 0], (1, 2, 0)).reshape(9, hidden)
            blk['s_dw'], blk['b_dw'] = bn_scale_bias(hidden)
            w_p = init_conv_weight(kg, out_c, hidden, 1).reshape(out_c, hidden)
            blk['w_proj'] = w_p.T.astype(jnp.bfloat16)
            blk['s_proj'], blk['b_proj'] = bn_scale_bias(out_c)
            blocks.append(blk)
            inp_c = out_c
        stages.append(blocks)
        if si in (1, 2, 3, 4, 5):       # wavelet_1 .. wavelet_5
            wavelet_blocks.append(make_wavelet_block(lastchannel, out_c))
            lastchannel = out_c

    params['stages'] = stages
    params['wavelet'] = wavelet_blocks

    last_c = _make_divisible(1280 * width_mult, div) if width_mult > 1.0 else 1280
    w_h = init_conv_weight(kg, last_c, inp_c, 1).reshape(last_c, inp_c)
    s_h, b_h = bn_scale_bias(last_c)
    params['head'] = dict(w=w_h.T.astype(jnp.bfloat16), s=s_h, b=b_h)

    w_cls = 0.01 * jax.random.normal(kg(), (num_classes, last_c), jnp.float32)
    params['classifier'] = dict(w=w_cls.T.astype(jnp.bfloat16),
                                b=jnp.zeros((num_classes,), jnp.float32))
    return params


# --------------------------- forward pass -------------------------------------

def inverted_residual_fwd(blk, x):
    inp = x
    h = x
    if blk['expand_ratio'] != 1:
        h = pointwise_conv_bn(h, blk['w_exp'], blk['s_exp'], blk['b_exp'],
                              act='relu6')
    h = depthwise3x3_bn_relu6(h, blk['w_dw'], blk['s_dw'], blk['b_dw'],
                              blk['stride'])
    res = inp if blk['identity'] else None
    return pointwise_conv_bn(h, blk['w_proj'], blk['s_proj'], blk['b_proj'],
                             act='none', residual=res)


def wavelet_block_fwd(p, Llast, original, x, downsample, compute_lnext=True):
    # Lin = ReLU(BN(conv1x1(Llast))) + ReLU(BN(conv3x3(original)))
    Lin = pointwise_conv_bn(Llast, p['w_in'], p['s_in'], p['b_in'], act='relu')
    Lin = conv3x3_bn_act(original, p['w_sup'], p['s_sup'], p['b_sup'],
                         stride=1, act='relu', residual=Lin)
    ori = x
    x = add_bn(x, Lin, p['s_x'], p['b_x'])           # bnx(x + Lin)
    if not compute_lnext:
        return x, None
    if downsample:
        Lin = haar_ll(Lin)
        ori = haar_ll(ori)
    Lnext = (Lin.astype(jnp.float32) + ori.astype(jnp.float32)).astype(jnp.bfloat16)
    return x, Lnext


def mobilenetv2_wavelet_forward(params, x_nchw):
    x = jnp.transpose(x_nchw, (0, 2, 3, 1)).astype(jnp.float32)   # NCHW -> NHWC

    # Haar LL pyramid (Lx128 .. Lx8 of the reference).
    L = {}
    cur = x
    for j in range(1, 6):
        cur = haar_ll(cur)
        L[j] = cur

    st = params['stem']
    feat = conv3x3_bn_act(x, st['w'], st['s'], st['b'], stride=2, act='relu6')

    wbs = params['wavelet']
    stages = params['stages']

    feat, Lnext = wavelet_block_fwd(wbs[0], L[1], L[1], feat, downsample=True)
    for blk in stages[0]:
        feat = inverted_residual_fwd(blk, feat)
    for blk in stages[1]:
        feat = inverted_residual_fwd(blk, feat)
    feat, Lnext = wavelet_block_fwd(wbs[1], Lnext, L[2], feat, downsample=True)
    for blk in stages[2]:
        feat = inverted_residual_fwd(blk, feat)
    feat, Lnext = wavelet_block_fwd(wbs[2], Lnext, L[3], feat, downsample=True)
    for blk in stages[3]:
        feat = inverted_residual_fwd(blk, feat)
    feat, Lnext = wavelet_block_fwd(wbs[3], Lnext, L[4], feat, downsample=False)
    for blk in stages[4]:
        feat = inverted_residual_fwd(blk, feat)
    feat, Lnext = wavelet_block_fwd(wbs[4], Lnext, L[4], feat, downsample=True)
    for blk in stages[5]:
        feat = inverted_residual_fwd(blk, feat)
    # wavelet_5: its Lnext output is unused downstream, so skip its DWT.
    feat, _ = wavelet_block_fwd(wbs[5], Lnext, L[5], feat, downsample=True,
                                compute_lnext=False)
    for blk in stages[6]:
        feat = inverted_residual_fwd(blk, feat)

    hd = params['head']
    feat = pointwise_conv_bn(feat, hd['w'], hd['s'], hd['b'], act='relu6')

    pooled = global_avg_pool(feat)                                 # (N, 1280)

    cls = params['classifier']
    ones = jnp.ones((cls['w'].shape[1],), jnp.float32)
    logits = matmul_bn_act(pooled, cls['w'], ones, cls['b'],
                           act='none', out_dtype=jnp.float32)
    return logits


# --------------------------- main ----------------------------------------------

if __name__ == "__main__":
    key = jax.random.PRNGKey(0)
    pkey, xkey = jax.random.split(key)

    params = build_params(pkey, num_classes=1000, width_mult=1.0)

    # Small input (NCHW).  64x64 keeps all 5 wavelet levels and the /32
    # downsample path well-defined while remaining tiny.
    x = jax.random.normal(xkey, (2, 3, 64, 64), jnp.float32)

    out = mobilenetv2_wavelet_forward(params, x)
    out = jax.block_until_ready(out)

    assert out.shape == (2, 1000), out.shape
    assert bool(jnp.all(jnp.isfinite(out)))
    print("KERNEL_OK")
</pallas_src>

<mosaic_0001>
module attributes {stable_mosaic.version = 11 : i64} {
  func.func @_mm_kernel(%arg0: i32, %arg1: i32, %arg2: memref<256x32xbf16, #tpu.memory_space<vmem>>, %arg3: memref<32x32xbf16, #tpu.memory_space<vmem>>, %arg4: memref<1x32xf32, #tpu.memory_space<vmem>>, %arg5: memref<1x32xf32, #tpu.memory_space<vmem>>, %arg6: memref<256x32xbf16, #tpu.memory_space<vmem>>) attributes {dimension_semantics = [#tpu.dimension_semantics<parallel>, #tpu.dimension_semantics<parallel>], iteration_bounds = array<i64: 8, 1>, scalar_prefetch = 0 : i64, scratch_operands = 0 : i64, tpu.core_type = #tpu.core_type<tc>, window_params = [{transform_indices = @transform_0, window_bounds = array<i64: 256, 32>}, {transform_indices = @transform_1, window_bounds = array<i64: 32, 32>}, {transform_indices = @transform_2, window_bounds = array<i64: 1, 32>}, {transform_indices = @transform_3, window_bounds = array<i64: 1, 32>}, {transform_indices = @transform_4, window_bounds = array<i64: 256, 32>}]} {
    %c0 = arith.constant 0 : index
    %c0_0 = arith.constant 0 : index
    %0 = vector.load %arg2[%c0, %c0_0] : memref<256x32xbf16, #tpu.memory_space<vmem>>, vector<256x32xbf16>
    %c0_1 = arith.constant 0 : index
    %c0_2 = arith.constant 0 : index
    %1 = vector.load %arg3[%c0_1, %c0_2] : memref<32x32xbf16, #tpu.memory_space<vmem>>, vector<32x32xbf16>
    %cst = arith.constant dense<0.000000e+00> : vector<256x32xf32>
    %2 = tpu.matmul %0, %1, %cst {dimension_numbers = #tpu.dot_dimension_numbers<[1], [0], [0], [1], [0, 0, 1, 1], [], []>} : vector<256x32xbf16>, vector<32x32xbf16>, vector<256x32xf32> -> vector<256x32xf32>
    %c0_3 = arith.constant 0 : index
    %c0_4 = arith.constant 0 : index
    %3 = vector.load %arg4[%c0_3, %c0_4] : memref<1x32xf32, #tpu.memory_space<vmem>>, vector<1x32xf32>
    %4 = vector.broadcast %3 : vector<1x32xf32> to vector<256x32xf32>
    %5 = arith.mulf %2, %4 : vector<256x32xf32>
    %c0_5 = arith.constant 0 : index
    %c0_6 = arith.constant 0 : index
    %6 = vector.load %arg5[%c0_5, %c0_6] : memref<1x32xf32, #tpu.memory_space<vmem>>, vector<1x32xf32>
    %7 = vector.broadcast %6 : vector<1x32xf32> to vector<256x32xf32>
    %8 = arith.addf %5, %7 : vector<256x32xf32>
    %cst_7 = arith.constant 0.000000e+00 : f32
    %cst_8 = arith.constant 6.000000e+00 : f32
    %9 = vector.broadcast %cst_7 : f32 to vector<256x32xf32>
    %10 = arith.maximumf %9, %8 : vector<256x32xf32>
    %11 = vector.broadcast %cst_8 : f32 to vector<256x32xf32>
    %12 = arith.minimumf %11, %10 : vector<256x32xf32>
    %13 = arith.truncf %12 : vector<256x32xf32> to vector<256x32xbf16>
    %c0_9 = arith.constant 0 : index
    %c0_10 = arith.constant 0 : index
    %14 = vector.load %arg6[%c0_9, %c0_10] : memref<256x32xbf16, #tpu.memory_space<vmem>>, vector<256x32xbf16>
    tpu.vector_store %arg6[%c0_9, %c0_10], %13 {strides = array<i32>} : memref<256x32xbf16, #tpu.memory_space<vmem>>, vector<256x32xbf16>,
    return
  }
  func.func @transform_0(%arg0: i32, %arg1: i32) -> (i32, i32) {
    %c0_i32 = arith.constant 0 : i32
    %c0_i32_0 = arith.constant 0 : i32
    return %arg0, %c0_i32 : i32, i32
  }
  func.func @transform_1(%arg0: i32, %arg1: i32) -> (i32, i32) {
    %c0_i32 = arith.constant 0 : i32
    %c0_i32_0 = arith.constant 0 : i32
    return %c0_i32, %arg1 : i32, i32
  }
  func.func @transform_2(%arg0: i32, %arg1: i32) -> (i32, i32) {
    %c0_i32 = arith.constant 0 : i32
    %c0_i32_0 = arith.constant 0 : i32
    return %c0_i32, %arg1 : i32, i32
  }
  func.func @transform_3(%arg0: i32, %arg1: i32) -> (i32, i32) {
    %c0_i32 = arith.constant 0 : i32
    %c0_i32_0 = arith.constant 0 : i32
    return %c0_i32, %arg1 : i32, i32
  }
  func.func @transform_4(%arg0: i32, %arg1: i32) -> (i32, i32) {
    %c0_i32 = arith.constant 0 : i32
    return %arg0, %arg1 : i32, i32
  }
}

</mosaic_0001>

<bundles_post_ra>
// kernel: tpu_custom_call.1
= control target key start
LH: loop header
LB: loop body
LE: loop exit
PB: predicated region body
PF: predicated region fallthrough
CT: control target
= control target key end

     0   :  { %s1285_s15 = smov 0   ;;  %s1287_s16 = smov 0   ;;  %s1505_s0 = inlined_call_operand.vmem [shape: bf16[2048,32], index: 0, kind: input, shape index: {}]   ;;  %s1506_s1 = inlined_call_operand.vmem [shape: bf16[32,32], index: 1, kind: input, shape index: {}]   ;;  %s1507_s2 = inlined_call_operand.vmem [shape: f32[1,32], index: 2, kind: input, shape index: {}]   ;;  %s1508_s3 = inlined_call_operand.vmem [shape: f32[1,32], index: 3, kind: input, shape index: {}]   ;;  %s1509_s4 = inlined_call_operand.vmem [shape: bf16[2048,32], index: 4, kind: output, shape index: {}]  }
   0x1   :  { %s1289_s17 = smov 0  }
   0x2 LB: > { %s26_s18 = sadd.s32 1, %s1254_s16  ;;  %p1029_p0 = scmp.ge.s32.totalorder %s1258_s17, 1  ;;  %s1258_s17 = sphi %s1289_s17, %s14_s17   ;;  %s1254_s16 = sphi %s1287_s16, %s1511_s16   ;;  %s1250_s15 = sphi %s1285_s15, %s1510_s15  }
   0x3   : > { %p28_p1 = scmp.ge.s32.totalorder %s26_s18, 8  ;;  %p202_p2 = scmp.lt.s32.totalorder %s1258_s17, 9 }
   0x5   : > { %s1513_s18 = smov (%p28_p1, %s26_s18), 0  ;;  %p203_p3 = pnand %p1029_p0, %p202_p2 }
   0x6   : > { %s1030_s21 = sshll.u32 (!%p203_p3), %s1250_s15, 5 }
   0x7   : > { %206 = sbr.rel (%p203_p3) target bundleno = 262 (0x106), region = 36  ;;  %p242_p4 = scmp.lt.s32.totalorder (!%p203_p3), %s1030_s21, 255 }
   0xc   : > { %v1218_v0 = vld [vmem:[%s1506_s1 + $0x8] sm:$0xff]   ;;  %v1219_v1 = vld [vmem:[%s1506_s1] sm:$0xff]   ;;  %s1515_s21 = smov (!%p242_p4, %s1030_s21), 255  ;;  %vm395_vm0 = vcmask 261120   ;;  %vm875_vm1 = vcmask 257024  }
   0xd   : > { %1154 = vmatprep.subr.bf16.mxu0 %v1218_v0  ;;  %1190 = vmatprep.subr.bf16.mxu1 %v1218_v0  ;;  %s1031_s24 = sshll.u32 %s1515_s21, 2  ;;  %v1354_v18 = vld [vmem:[%s1507_s2] ss:$0 sm:$0xff] }
   0xe   : > { %1155 = vmatpush3.bf16.msra.mxu0 %v1218_v0  ;;  %1192 = vmatpush3.bf16.msra.mxu1 %v1218_v0  ;;  %s1317_s27 = scalar_lea.vmem %s1505_s0, %s1031_s24  ;;  %v1359_v20 = vld [vmem:[%s1508_s3] ss:$0 sm:$0xff]  ;;  %s1378_s8 = scalar_lea.vmem %s1509_s4, %s1031_s24 }
   0xf   : > { %1156 = vmatprep.subr.bf16.mxu0 %v1219_v1  ;;  %1191 = vmatprep.subr.bf16.mxu1 %v1219_v1  ;;  %v1220_v2 = vld [vmem:[%s1317_s27] sm:$0xff]   ;;  %v1222_v4 = vld [vmem:[%s1317_s27 + $0x8] sm:$0xff]   ;;  %v1224_v6 = vld [vmem:[%s1317_s27 + $0x10] sm:$0xff]  }
  0x10   : > { %v1221_v3 = vld [vmem:[%s1317_s27 + $0x40] sm:$0xff]   ;;  %1158 = vmatprep.mubr.msk.bf16.mxu0 %vm395_vm0, %v1220_v2  ;;  %v1223_v5 = vld [vmem:[%s1317_s27 + $0x48] sm:$0xff]   ;;  %v1225_v7 = vld [vmem:[%s1317_s27 + $0x50] sm:$0xff]  }
  0x11   : > { %1174 = vmatprep.mubr.msk.bf16.mxu1 %vm395_vm0, %v1221_v3  ;;  %v1226_v8 = vld [vmem:[%s1317_s27 + $0x18] sm:$0xff]   ;;  %v1228_v10 = vld [vmem:[%s1317_s27 + $0x20] sm:$0xff]   ;;  %v1230_v12 = vld [vmem:[%s1317_s27 + $0x28] sm:$0xff]  }
  0x12   : > { %1157 = vmatpush3.bf16.msra.mxu0 %v1219_v1  ;;  %1193 = vmatpush3.bf16.msra.mxu1 %v1219_v1  ;;  %v1227_v9 = vld [vmem:[%s1317_s27 + $0x58] sm:$0xff]   ;;  %v1229_v11 = vld [vmem:[%s1317_s27 + $0x60] sm:$0xff]   ;;  %v1231_v13 = vld [vmem:[%s1317_s27 + $0x68] sm:$0xff]  }
  0x13   : > { %v1232_v14 = vld [vmem:[%s1317_s27 + $0x30] sm:$0xff]   ;;  %v1234_v16 = vld [vmem:[%s1317_s27 + $0x38] sm:$0xff]  }
  0x14   : > { %v1233_v15 = vld [vmem:[%s1317_s27 + $0x70] sm:$0xff]   ;;  %v1235_v17 = vld [vmem:[%s1317_s27 + $0x78] sm:$0xff]  }
  0x15   : > { %1159 = vmatmul.mubr.msk.bf16.vlgmr.msra.gmra.mxu0 %vm395_vm0, %v1222_v4  ;;  %1175 = vmatmul.mubr.msk.bf16.vlgmr.msra.gmra.mxu1 %vm395_vm0, %v1223_v5 }
  0x16   : > { %1162 = vmatprep.mubr.msk.bf16.mxu0 %vm395_vm0, %v1224_v6  ;;  %1178 = vmatprep.mubr.msk.bf16.mxu1 %vm395_vm0, %v1225_v7 }
  0x1d   : > { %1163 = vmatmul.mubr.msk.bf16.gmra.mxu0 %vm395_vm0, %v1226_v8  ;;  %1179 = vmatmul.mubr.msk.bf16.gmra.mxu1 %vm395_vm0, %v1227_v9 }
  0x1e   : > { %1166 = vmatprep.mubr.msk.bf16.mxu0 %vm395_vm0, %v1228_v10  ;;  %1182 = vmatprep.mubr.msk.bf16.mxu1 %vm395_vm0, %v1229_v11 }
  0x25   : > { %1167 = vmatmul.mubr.msk.bf16.gmra.mxu0 %vm395_vm0, %v1230_v12  ;;  %1183 = vmatmul.mubr.msk.bf16.gmra.mxu1 %vm395_vm0, %v1231_v13 }
  0x26   : > { %1170 = vmatprep.mubr.msk.bf16.mxu0 %vm395_vm0, %v1232_v14  ;;  %1186 = vmatprep.mubr.msk.bf16.mxu1 %vm395_vm0, %v1233_v15 }
  0x2d   : > { %1171 = vmatmul.mubr.msk.bf16.gmra.mxu0 %vm395_vm0, %v1234_v16  ;;  %1187 = vmatmul.mubr.msk.bf16.gmra.mxu1 %vm395_vm0, %v1235_v17 }
  0xd5   : > { %v1160_v19 = vpop.f32.mrf.mxu0  ;;  %v1176_v22 = vpop.f32.mrf.mxu1 }
  0xd6   : > { %v614_v21 = vmul.f32 %v1160_v19, %v1354_v18  ;;  %v630_v23 = vmul.f32 %v1176_v22, %v1354_v18 }
  0xd7   : > { %v478_v24 = vpop.f32.mrf.mxu0  ;;  %v542_v27 = vpop.f32.mrf.mxu1 }
  0xd8   : > { %v653_v25 = vadd.f32 %v1359_v20, %v614_v21  ;;  %v612_v26 = vmul.f32 %v1354_v18, %v478_v24  ;;  %v669_v28 = vadd.f32 %v1359_v20, %v630_v23  ;;  %v628_v29 = vmul.f32 %v1354_v18, %v542_v27 }
  0xd9   : > { %v1161_v30 = vpop.f32.mrf.mxu0  ;;  %v1177_v34 = vpop.f32.mrf.mxu1 }
  0xda   : > { %v685_v31 = vmax.f32 %v653_v25, 0.0  ;;  %v651_v32 = vadd.f32 %v1359_v20, %v612_v26  ;;  %v615_v33 = vmul.f32 %v1161_v30, %v1354_v18  ;;  %v701_v35 = vmax.f32 %v669_v28, 0.0 }
  0xdb   : > { %v667_v36 = vadd.f32 %v1359_v20, %v628_v29  ;;  %v631_v37 = vmul.f32 %v1177_v34, %v1354_v18  ;;  %v481_v38 = vpop.f32.mrf.mxu0  ;;  %v545_v43 = vpop.f32.mrf.mxu1 }
  0xdc   : > { %v717_v39 = vmin.f32 %v685_v31, 6.0  ;;  %v683_v40 = vmax.f32 %v651_v32, 0.0  ;;  %v654_v41 = vadd.f32 %v1359_v20, %v615_v33  ;;  %v613_v42 = vmul.f32 %v1354_v18, %v481_v38 }
  0xdd   : > { %v733_v44 = vmin.f32 %v701_v35, 6.0  ;;  %v699_v45 = vmax.f32 %v667_v36, 0.0  ;;  %v670_v46 = vadd.f32 %v1359_v20, %v631_v37  ;;  %v629_v47 = vmul.f32 %v1354_v18, %v545_v43  ;;  %v1164_v48 = vpop.f32.mrf.mxu0  ;;  %v1180_v53 = vpop.f32.mrf.mxu1 }
  0xde   : > { %v1106_v49 = vpack.c.bf16 %v717_v39, %v717_v39  ;;  %v715_v50 = vmin.f32 %v683_v40, 6.0  ;;  %v686_v51 = vmax.f32 %v654_v41, 0.0  ;;  %v652_v52 = vadd.f32 %v1359_v20, %v613_v42 }
  0xdf   : > { %v1122_v54 = vpack.c.bf16 %v733_v44, %v733_v44  ;;  %v731_v55 = vmin.f32 %v699_v45, 6.0  ;;  %v702_v56 = vmax.f32 %v670_v46, 0.0  ;;  %v668_v57 = vadd.f32 %v1359_v20, %v629_v47  ;;  %v494_v58 = vpop.f32.mrf.mxu0  ;;  %v558_v63 = vpop.f32.mrf.mxu1 }
  0xe0   : > { %878 = vst.msk [vmem:[%s1378_s8 + $0x8] sm:$0xf] %vm875_vm1, %v1106_v49  ;;  %v1104_v59 = vpack.c.bf16 %v715_v50, %v715_v50  ;;  %v718_v60 = vmin.f32 %v686_v51, 6.0  ;;  %v684_v61 = vmax.f32 %v652_v52, 0.0  ;;  %v618_v62 = vmul.f32 %v1164_v48, %v1354_v18 }
  0xe1   : > { %894 = vst.msk [vmem:[%s1378_s8 + $0x48] sm:$0xf] %vm875_vm1, %v1122_v54  ;;  %v1120_v0 = vpack.c.bf16 %v731_v55, %v731_v55  ;;  %v734_v1 = vmin.f32 %v702_v56, 6.0  ;;  %v700_v2 = vmax.f32 %v668_v57, 0.0  ;;  %v634_v3 = vmul.f32 %v1180_v53, %v1354_v18  ;;  %v1165_v4 = vpop.f32.mrf.mxu0  ;;  %v1181_v9 = vpop.f32.mrf.mxu1 }
  0xe2   : > { %876 = vst.msk [vmem:[%s1378_s8] sm:$0xf] %vm875_vm1, %v1104_v59  ;;  %v1107_v5 = vpack.c.bf16 %v718_v60, %v718_v60  ;;  %v716_v6 = vmin.f32 %v684_v61, 6.0  ;;  %v657_v7 = vadd.f32 %v1359_v20, %v618_v62  ;;  %v616_v8 = vmul.f32 %v1354_v18, %v494_v58 }
  0xe3   : > { %892 = vst.msk [vmem:[%s1378_s8 + $0x40] sm:$0xf] %vm875_vm1, %v1120_v0  ;;  %v1123_v10 = vpack.c.bf16 %v734_v1, %v734_v1  ;;  %v732_v11 = vmin.f32 %v700_v2, 6.0  ;;  %v673_v12 = vadd.f32 %v1359_v20, %v634_v3  ;;  %v632_v13 = vmul.f32 %v1354_v18, %v558_v63  ;;  %v497_v14 = vpop.f32.mrf.mxu0  ;;  %v561_v21 = vpop.f32.mrf.mxu1 }
  0xe4   : > { %879 = vst.msk [vmem:[%s1378_s8 + $0xc] sm:$0xf] %vm875_vm1, %v1107_v5  ;;  %v1105_v15 = vpack.c.bf16 %v716_v6, %v716_v6  ;;  %v689_v16 = vmax.f32 %v657_v7, 0.0  ;;  %v655_v17 = vadd.f32 %v1359_v20, %v616_v8  ;;  %v619_v19 = vmul.f32 %v1165_v4, %v1354_v18 }
  0xe5   : > { %895 = vst.msk [vmem:[%s1378_s8 + $0x4c] sm:$0xf] %vm875_vm1, %v1123_v10  ;;  %v1121_v22 = vpack.c.bf16 %v732_v11, %v732_v11  ;;  %v705_v23 = vmax.f32 %v673_v12, 0.0  ;;  %v671_v24 = vadd.f32 %v1359_v20, %v632_v13  ;;  %v635_v25 = vmul.f32 %v1181_v9, %v1354_v18  ;;  %v1168_v26 = vpop.f32.mrf.mxu0  ;;  %v1184_v31 = vpop.f32.mrf.mxu1 }
  0xe6   : > { %877 = vst.msk [vmem:[%s1378_s8 + $0x4] sm:$0xf] %vm875_vm1, %v1105_v15  ;;  %v721_v27 = vmin.f32 %v689_v16, 6.0  ;;  %v687_v28 = vmax.f32 %v655_v17, 0.0  ;;  %v658_v29 = vadd.f32 %v1359_v20, %v619_v19  ;;  %v617_v30 = vmul.f32 %v1354_v18, %v497_v14 }
  0xe7   : > { %893 = vst.msk [vmem:[%s1378_s8 + $0x44] sm:$0xf] %vm875_vm1, %v1121_v22  ;;  %v737_v32 = vmin.f32 %v705_v23, 6.0  ;;  %v703_v33 = vmax.f32 %v671_v24, 0.0  ;;  %v674_v34 = vadd.f32 %v1359_v20, %v635_v25  ;;  %v633_v35 = vmul.f32 %v1354_v18, %v561_v21  ;;  %v510_v36 = vpop.f32.mrf.mxu0  ;;  %v574_v41 = vpop.f32.mrf.mxu1 }
  0xe8   : > { %v1110_v37 = vpack.c.bf16 %v721_v27, %v721_v27  ;;  %v719_v38 = vmin.f32 %v687_v28, 6.0  ;;  %v690_v39 = vmax.f32 %v658_v29, 0.0  ;;  %v656_v40 = vadd.f32 %v1359_v20, %v617_v30 }
  0xe9   : > { %v1126_v42 = vpack.c.bf16 %v737_v32, %v737_v32  ;;  %v735_v43 = vmin.f32 %v703_v33, 6.0  ;;  %v706_v44 = vmax.f32 %v674_v34, 0.0  ;;  %v672_v45 = vadd.f32 %v1359_v20, %v633_v35  ;;  %v1169_v46 = vpop.f32.mrf.mxu0  ;;  %v1185_v51 = vpop.f32.mrf.mxu1 }
  0xea   : > { %882 = vst.msk [vmem:[%s1378_s8 + $0x18] sm:$0xf] %vm875_vm1, %v1110_v37  ;;  %v1108_v47 = vpack.c.bf16 %v719_v38, %v719_v38  ;;  %v722_v48 = vmin.f32 %v690_v39, 6.0  ;;  %v688_v49 = vmax.f32 %v656_v40, 0.0  ;;  %v622_v50 = vmul.f32 %v1168_v26, %v1354_v18 }
  0xeb   : > { %898 = vst.msk [vmem:[%s1378_s8 + $0x58] sm:$0xf] %vm875_vm1, %v1126_v42  ;;  %v1124_v52 = vpack.c.bf16 %v735_v43, %v735_v43  ;;  %v738_v53 = vmin.f32 %v706_v44, 6.0  ;;  %v704_v54 = vmax.f32 %v672_v45, 0.0  ;;  %v638_v55 = vmul.f32 %v1184_v31, %v1354_v18  ;;  %v513_v56 = vpop.f32.mrf.mxu0  ;;  %v577_v61 = vpop.f32.mrf.mxu1 }
  0xec   : > { %880 = vst.msk [vmem:[%s1378_s8 + $0x10] sm:$0xf] %vm875_vm1, %v1108_v47  ;;  %v1111_v57 = vpack.c.bf16 %v722_v48, %v722_v48  ;;  %v720_v58 = vmin.f32 %v688_v49, 6.0  ;;  %v661_v59 = vadd.f32 %v1359_v20, %v622_v50  ;;  %v620_v60 = vmul.f32 %v1354_v18, %v510_v36 }
  0xed   : > { %896 = vst.msk [vmem:[%s1378_s8 + $0x50] sm:$0xf] %vm875_vm1, %v1124_v52  ;;  %v1127_v62 = vpack.c.bf16 %v738_v53, %v738_v53  ;;  %v736_v63 = vmin.f32 %v704_v54, 6.0  ;;  %v677_v0 = vadd.f32 %v1359_v20, %v638_v55  ;;  %v636_v1 = vmul.f32 %v1354_v18, %v574_v41  ;;  %v1172_v2 = vpop.f32.mrf.mxu0  ;;  %v1188_v7 = vpop.f32.mrf.mxu1 }
  0xee   : > { %883 = vst.msk [vmem:[%s1378_s8 + $0x1c] sm:$0xf] %vm875_vm1, %v1111_v57  ;;  %v1109_v3 = vpack.c.bf16 %v720_v58, %v720_v58  ;;  %v693_v4 = vmax.f32 %v661_v59, 0.0  ;;  %v659_v5 = vadd.f32 %v1359_v20, %v620_v60  ;;  %v623_v6 = vmul.f32 %v1169_v46, %v1354_v18 }
  0xef   : > { %899 = vst.msk [vmem:[%s1378_s8 + $0x5c] sm:$0xf] %vm875_vm1, %v1127_v62  ;;  %v1125_v8 = vpack.c.bf16 %v736_v63, %v736_v63  ;;  %v709_v9 = vmax.f32 %v677_v0, 0.0  ;;  %v675_v10 = vadd.f32 %v1359_v20, %v636_v1  ;;  %v639_v11 = vmul.f32 %v1185_v51, %v1354_v18  ;;  %v526_v12 = vpop.f32.mrf.mxu0  ;;  %v590_v17 = vpop.f32.mrf.mxu1 }
  0xf0   : > { %881 = vst.msk [vmem:[%s1378_s8 + $0x14] sm:$0xf] %vm875_vm1, %v1109_v3  ;;  %v725_v13 = vmin.f32 %v693_v4, 6.0  ;;  %v691_v14 = vmax.f32 %v659_v5, 0.0  ;;  %v662_v15 = vadd.f32 %v1359_v20, %v623_v6  ;;  %v621_v16 = vmul.f32 %v1354_v18, %v513_v56 }
  0xf1   : > { %897 = vst.msk [vmem:[%s1378_s8 + $0x54] sm:$0xf] %vm875_vm1, %v1125_v8  ;;  %v741_v19 = vmin.f32 %v709_v9, 6.0  ;;  %v707_v21 = vmax.f32 %v675_v10, 0.0  ;;  %v678_v22 = vadd.f32 %v1359_v20, %v639_v11  ;;  %v637_v23 = vmul.f32 %v1354_v18, %v577_v61  ;;  %v1173_v32 = vpop.f32.mrf.mxu0  ;;  %v1189_v37 = vpop.f32.mrf.mxu1 }
  0xf2   : > { %v1114_v24 = vpack.c.bf16 %v725_v13, %v725_v13  ;;  %v723_v25 = vmin.f32 %v691_v14, 6.0  ;;  %v694_v26 = vmax.f32 %v662_v15, 0.0  ;;  %v660_v27 = vadd.f32 %v1359_v20, %v621_v16 }
  0xf3   : > { %v1130_v28 = vpack.c.bf16 %v741_v19, %v741_v19  ;;  %v739_v29 = vmin.f32 %v707_v21, 6.0  ;;  %v710_v30 = vmax.f32 %v678_v22, 0.0  ;;  %v676_v31 = vadd.f32 %v1359_v20, %v637_v23  ;;  %v529_v50 = vpop.f32.mrf.mxu0  ;;  %v593_v55 = vpop.f32.mrf.mxu1 }
  0xf4   : > { %886 = vst.msk [vmem:[%s1378_s8 + $0x28] sm:$0xf] %vm875_vm1, %v1114_v24  ;;  %v1112_v33 = vpack.c.bf16 %v723_v25, %v723_v25  ;;  %v726_v34 = vmin.f32 %v694_v26, 6.0  ;;  %v692_v35 = vmax.f32 %v660_v27, 0.0  ;;  %v626_v36 = vmul.f32 %v1172_v2, %v1354_v18 }
  0xf5   : > { %902 = vst.msk [vmem:[%s1378_s8 + $0x68] sm:$0xf] %vm875_vm1, %v1130_v28  ;;  %v1128_v38 = vpack.c.bf16 %v739_v29, %v739_v29  ;;  %v742_v39 = vmin.f32 %v710_v30, 6.0  ;;  %v708_v40 = vmax.f32 %v676_v31, 0.0  ;;  %v642_v41 = vmul.f32 %v1188_v7, %v1354_v18 }
  0xf6   : > { %884 = vst.msk [vmem:[%s1378_s8 + $0x20] sm:$0xf] %vm875_vm1, %v1112_v33  ;;  %v1115_v42 = vpack.c.bf16 %v726_v34, %v726_v34  ;;  %v724_v43 = vmin.f32 %v692_v35, 6.0  ;;  %v665_v44 = vadd.f32 %v1359_v20, %v626_v36  ;;  %v624_v45 = vmul.f32 %v1354_v18, %v526_v12 }
  0xf7   : > { %900 = vst.msk [vmem:[%s1378_s8 + $0x60] sm:$0xf] %vm875_vm1, %v1128_v38  ;;  %v1131_v46 = vpack.c.bf16 %v742_v39, %v742_v39  ;;  %v740_v47 = vmin.f32 %v708_v40, 6.0  ;;  %v681_v48 = vadd.f32 %v1359_v20, %v642_v41  ;;  %v640_v49 = vmul.f32 %v1354_v18, %v590_v17 }
  0xf8   : > { %887 = vst.msk [vmem:[%s1378_s8 + $0x2c] sm:$0xf] %vm875_vm1, %v1115_v42  ;;  %v1113_v51 = vpack.c.bf16 %v724_v43, %v724_v43  ;;  %v697_v52 = vmax.f32 %v665_v44, 0.0  ;;  %v663_v53 = vadd.f32 %v1359_v20, %v624_v45  ;;  %v627_v54 = vmul.f32 %v1173_v32, %v1354_v18 }
  0xf9   : > { %903 = vst.msk [vmem:[%s1378_s8 + $0x6c] sm:$0xf] %vm875_vm1, %v1131_v46  ;;  %v1129_v56 = vpack.c.bf16 %v740_v47, %v740_v47  ;;  %v713_v57 = vmax.f32 %v681_v48, 0.0  ;;  %v679_v58 = vadd.f32 %v1359_v20, %v640_v49  ;;  %v643_v59 = vmul.f32 %v1189_v37, %v1354_v18 }
  0xfa   : > { %885 = vst.msk [vmem:[%s1378_s8 + $0x24] sm:$0xf] %vm875_vm1, %v1113_v51  ;;  %v729_v60 = vmin.f32 %v697_v52, 6.0  ;;  %v695_v61 = vmax.f32 %v663_v53, 0.0  ;;  %v666_v62 = vadd.f32 %v1359_v20, %v627_v54  ;;  %v625_v63 = vmul.f32 %v1354_v18, %v529_v50 }
  0xfb   : > { %901 = vst.msk [vmem:[%s1378_s8 + $0x64] sm:$0xf] %vm875_vm1, %v1129_v56  ;;  %v745_v0 = vmin.f32 %v713_v57, 6.0  ;;  %v711_v1 = vmax.f32 %v679_v58, 0.0  ;;  %v682_v2 = vadd.f32 %v1359_v20, %v643_v59  ;;  %v641_v3 = vmul.f32 %v1354_v18, %v593_v55 }
  0xfc   : > { %v1118_v4 = vpack.c.bf16 %v729_v60, %v729_v60  ;;  %v727_v5 = vmin.f32 %v695_v61, 6.0  ;;  %v698_v6 = vmax.f32 %v666_v62, 0.0  ;;  %v664_v7 = vadd.f32 %v1359_v20, %v625_v63 }
  0xfd   : > { %v1134_v8 = vpack.c.bf16 %v745_v0, %v745_v0  ;;  %v743_v9 = vmin.f32 %v711_v1, 6.0  ;;  %v714_v10 = vmax.f32 %v682_v2, 0.0  ;;  %v680_v11 = vadd.f32 %v1359_v20, %v641_v3 }
  0xfe   : > { %890 = vst.msk [vmem:[%s1378_s8 + $0x38] sm:$0xf] %vm875_vm1, %v1118_v4  ;;  %v1116_v12 = vpack.c.bf16 %v727_v5, %v727_v5  ;;  %v730_v13 = vmin.f32 %v698_v6, 6.0  ;;  %v696_v18 = vmax.f32 %v664_v7, 0.0 }
  0xff   : > { %906 = vst.msk [vmem:[%s1378_s8 + $0x78] sm:$0xf] %vm875_vm1, %v1134_v8  ;;  %v1132_v14 = vpack.c.bf16 %v743_v9, %v743_v9  ;;  %v746_v15 = vmin.f32 %v714_v10, 6.0  ;;  %v712_v16 = vmax.f32 %v680_v11, 0.0 }
 0x100   : > { %888 = vst.msk [vmem:[%s1378_s8 + $0x30] sm:$0xf] %vm875_vm1, %v1116_v12  ;;  %v1119_v17 = vpack.c.bf16 %v730_v13, %v730_v13  ;;  %v728_v19 = vmin.f32 %v696_v18, 6.0 }
 0x101   : > { %904 = vst.msk [vmem:[%s1378_s8 + $0x70] sm:$0xf] %vm875_vm1, %v1132_v14  ;;  %v1135_v20 = vpack.c.bf16 %v746_v15, %v746_v15  ;;  %v744_v21 = vmin.f32 %v712_v16, 6.0 }
 0x102   : > { %891 = vst.msk [vmem:[%s1378_s8 + $0x3c] sm:$0xf] %vm875_vm1, %v1119_v17  ;;  %v1117_v22 = vpack.c.bf16 %v728_v19, %v728_v19 }
 0x103   : > { %907 = vst.msk [vmem:[%s1378_s8 + $0x7c] sm:$0xf] %vm875_vm1, %v1135_v20  ;;  %v1133_v23 = vpack.c.bf16 %v744_v21, %v744_v21 }
 0x104   : > { %889 = vst.msk [vmem:[%s1378_s8 + $0x34] sm:$0xf] %vm875_vm1, %v1117_v22 }
 0x105   : > { %905 = vst.msk [vmem:[%s1378_s8 + $0x74] sm:$0xf] %vm875_vm1, %v1133_v23 }
 0x106 PF: > { %s14_s17 = sadd.s32 1, %s1258_s17   ;;  %s1510_s15 = smov %s1254_s16 }
 0x107   : > { %p11_p5 = scmp.ge.s32.totalorder %s14_s17, 10   ;;  %s1511_s16 = smov %s1513_s18 }
 0x109   :  { %13 = sbr.rel (!%p11_p5) target bundleno = 2 (0x2), region = 75 }

</bundles_post_ra>
